<compile_context>
chip_gen: v7x
topology: tpu7x:2x2x1
jax: 0.10.0
libtpu: 0.0.40
codegen_flags: <defaults>
</compile_context>

<pallas_src>
import functools

import jax
import jax.numpy as jnp
from jax.experimental import pallas as pl
from jax.experimental.pallas import tpu as pltpu

_LANES = 128
_SUBLANES = 8
_TILE_ELEMS = _SUBLANES * _LANES            # 1024 = one (8,128) f32 tile
_CHUNK_ROWS = 512                           # inner sub-chunk: 512*128*4B = 256 KiB f32
_TARGET_BLOCK_BYTES = 4 * 1024 * 1024       # ~4 MiB per input block (double-buffered: 8 MiB)
_DEFAULT_MIN_PALLAS_ELEMS = 65536           # below this, plain jnp is faster than a launch


def _elementwise_loss(x, label, gan_type):
    """Elementwise loss against a *constant* label. Works on jnp arrays in or out of kernel."""
    if gan_type in ("gan", "ragan"):
        sp = jnp.log1p(jnp.exp(-jnp.abs(x)))        # stable softplus(-|x|)
        if label == 1.0:
            return jnp.maximum(-x, 0.0) + sp        # relu(-x) + softplus(-|x|)
        if label == 0.0:
            return jnp.maximum(x, 0.0) + sp         # relu(x)  + softplus(-|x|)
        return jnp.maximum(x, 0.0) - x * label + sp
    if gan_type == "lsgan":
        d = x - label
        return d * d
    if gan_type == "wgan-gp":
        return x
    raise NotImplementedError("GAN type [{:s}] is not found".format(gan_type))


def _gan_loss_sum_kernel(x_ref, out_ref, acc_ref, *, gan_type, label,
                         block_rows, chunk_rows, num_blocks, valid_last_rows):
    """Streams one (block_rows,128) block, accumulates the loss sum into acc_ref (8,128)."""
    j = pl.program_id(0)

    @pl.when(j == 0)
    def _init():
        acc_ref[...] = jnp.zeros_like(acc_ref)

    def _accumulate(row_count):
        # `row_count` is a Python int (static); raggedness is resolved with static slices,
        # so no iota/mask and no OOB reads of the VMEM block are ever emitted.
        full_chunks = row_count // chunk_rows
        rem = row_count % chunk_rows                # multiple of 8 by construction

        def _add(rows_slice):
            x = rows_slice.astype(jnp.float32)
            loss = _elementwise_loss(x, label, gan_type)
            # (rows,128) -> (8,128): pure vreg-wise VPU adds, no cross-lane work.
            acc_ref[...] += loss.reshape(-1, _SUBLANES, _LANES).sum(axis=0)

        if full_chunks > 0:
            @pl.loop(0, full_chunks)
            def _chunks(ci):
                r0 = pl.multiple_of(ci * chunk_rows, chunk_rows)
                _add(x_ref[pl.ds(r0, chunk_rows), :])

        if rem:
            _add(x_ref[pl.ds(full_chunks * chunk_rows, rem), :])

    if valid_last_rows == block_rows:
        # block_rows divides rows: every block is full, no runtime branching needed.
        _accumulate(block_rows)
    else:
        @pl.when(j < num_blocks - 1)
        def _full_block():
            _accumulate(block_rows)

        @pl.when(j == num_blocks - 1)
        def _ragged_block():
            _accumulate(valid_last_rows)

    @pl.when(j == num_blocks - 1)
    def _finalize():
        # Single cross-lane reduce for the whole call; scalar lands in SMEM.
        out_ref[0, 0] = jnp.sum(acc_ref[...])


def _gan_loss_sum_pallas(x2d, label, gan_type, block_bytes=_TARGET_BLOCK_BYTES):
    """Sum of the elementwise loss over a (rows,128) array; rows is a multiple of 8."""
    rows, _ = x2d.shape
    itemsize = jnp.dtype(x2d.dtype).itemsize
    max_block_rows = max(
        _CHUNK_ROWS, (block_bytes // (_LANES * itemsize)) // _CHUNK_ROWS * _CHUNK_ROWS)
    block_rows = min(max_block_rows, rows)          # multiple of 8 (or == rows)
    num_blocks = (rows + block_rows - 1) // block_rows
    valid_last_rows = rows - (num_blocks - 1) * block_rows
    chunk_rows = min(_CHUNK_ROWS, block_rows)

    kernel = functools.partial(
        _gan_loss_sum_kernel, gan_type=gan_type, label=float(label),
        block_rows=block_rows, chunk_rows=chunk_rows,
        num_blocks=num_blocks, valid_last_rows=valid_last_rows)

    partial_sum = pl.pallas_call(
        kernel,
        out_shape=jax.ShapeDtypeStruct((1, 1), jnp.float32),
        grid_spec=pltpu.PrefetchScalarGridSpec(
            num_scalar_prefetch=0,
            grid=(num_blocks,),
            in_specs=[pl.BlockSpec((block_rows, _LANES), lambda j: (j, 0))],
            out_specs=pl.BlockSpec((1, 1), lambda j: (0, 0),
                                   memory_space=pltpu.MemorySpace.SMEM),
            scratch_shapes=[pltpu.VMEM((_SUBLANES, _LANES), jnp.float32)],
        ),
        compiler_params=pltpu.CompilerParams(
            dimension_semantics=("arbitrary",)),
    )(x2d)
    return partial_sum[0, 0]


def _gan_loss_mean(x, label, gan_type,
                   min_pallas_elems=_DEFAULT_MIN_PALLAS_ELEMS,
                   block_bytes=_TARGET_BLOCK_BYTES):
    """Mean of the elementwise GAN loss of `x` against a constant label."""
    if gan_type not in ("gan", "ragan", "lsgan", "wgan-gp"):
        raise NotImplementedError("GAN type [{:s}] is not found".format(gan_type))
    n = int(x.size)
    if not jnp.issubdtype(x.dtype, jnp.floating) or x.dtype == jnp.float64:
        x = x.astype(jnp.float32)
    x_flat = jnp.ravel(x)
    label = float(label)

    # Small-input fast path: launch overhead dwarfs the work, let XLA fuse it.
    if n < _TILE_ELEMS or n < min_pallas_elems:
        return jnp.mean(_elementwise_loss(x_flat.astype(jnp.float32), label, gan_type))

    # Kernel consumes the 1024-aligned prefix; the tiny (<1024 elem) tail goes through jnp.
    n_main = (n // _TILE_ELEMS) * _TILE_ELEMS
    x_main = x_flat if n_main == n else x_flat[:n_main]
    x2d = x_main.reshape(n_main // _LANES, _LANES)
    total = _gan_loss_sum_pallas(x2d, label, gan_type, block_bytes=block_bytes)
    if n_main != n:
        tail = x_flat[n_main:].astype(jnp.float32)
        total = total + jnp.sum(_elementwise_loss(tail, label, gan_type))
    return total / jnp.float32(n)


class GANLoss:
    """Pallas/JAX port of the PyTorch GANLoss module (forward pass only)."""

    def __init__(self, gan_type="gan", real_label_val=1.0, fake_label_val=0.0,
                 min_pallas_elems=_DEFAULT_MIN_PALLAS_ELEMS):
        self.gan_type = gan_type.lower()
        self.real_label_val = float(real_label_val)
        self.fake_label_val = float(fake_label_val)
        self.min_pallas_elems = int(min_pallas_elems)
        if self.gan_type not in ("gan", "ragan", "lsgan", "wgan-gp"):
            raise NotImplementedError(
                "GAN type [{:s}] is not found".format(self.gan_type))

    def get_target_label(self, target_is_real):
        if self.gan_type == "wgan-gp":
            return target_is_real
        return self.real_label_val if target_is_real else self.fake_label_val

    def __call__(self, input, target_is_real):
        if self.gan_type == "wgan-gp":
            mean = _gan_loss_mean(input, 0.0, "wgan-gp",
                                  min_pallas_elems=self.min_pallas_elems)
            return -mean if target_is_real else mean
        label = self.get_target_label(target_is_real)
        return _gan_loss_mean(input, label, self.gan_type,
                              min_pallas_elems=self.min_pallas_elems)

    forward = __call__


def _reference(x, label, gan_type):
    x = jnp.ravel(x).astype(jnp.float32)
    if gan_type in ("gan", "ragan"):
        loss = jnp.maximum(x, 0.0) - x * label + jnp.log1p(jnp.exp(-jnp.abs(x)))
    elif gan_type == "lsgan":
        loss = (x - label) ** 2
    else:
        loss = x
    return jnp.mean(loss)


if __name__ == "__main__":
    k0, k1, k2 = jax.random.split(jax.random.PRNGKey(0), 3)
    # NCHW discriminator logits, as GANLoss would see them from a segmentation GAN head.
    logits = jax.random.normal(k0, (2, 4, 16, 16), dtype=jnp.float32) * 3.0

    ok = True

    # --- Pallas path forced for the small demo tensor (min_pallas_elems=0) ---
    bce = GANLoss("gan", real_label_val=1.0, fake_label_val=0.0, min_pallas_elems=0)
    for is_real, label in ((True, 1.0), (False, 0.0)):
        out = jax.block_until_ready(bce(logits, is_real))
        ref = _reference(logits, label, "gan")
        ok &= bool(jnp.allclose(out, ref, rtol=1e-5, atol=1e-5))

    ls = GANLoss("lsgan", min_pallas_elems=0)
    out = jax.block_until_ready(ls(logits, True))
    ok &= bool(jnp.allclose(out, _reference(logits, 1.0, "lsgan"), rtol=1e-5, atol=1e-5))

    wg = GANLoss("wgan-gp", min_pallas_elems=0)
    out = jax.block_until_ready(wg(logits, True))
    ok &= bool(jnp.allclose(out, -_reference(logits, 0.0, "wgan-gp"), rtol=1e-5, atol=1e-5))

    # --- Default small-input fast path (pure jnp) on the same tensor ---
    bce_default = GANLoss("gan")
    out = jax.block_until_ready(bce_default(logits, True))
    ok &= bool(jnp.allclose(out, _reference(logits, 1.0, "gan"), rtol=1e-5, atol=1e-5))

    # --- Ragged element count (not a multiple of 1024): Pallas prefix + jnp tail ---
    logits_ragged = jax.random.normal(k1, (3, 5, 17, 13), dtype=jnp.float32) * 2.0
    out = jax.block_until_ready(bce(logits_ragged, True))
    ok &= bool(jnp.allclose(out, _reference(logits_ragged, 1.0, "gan"), rtol=1e-5, atol=1e-5))

    # --- Medium tensor: exercises the inner pl.loop chunking; also multi-block +
    #     ragged-last-block path via a small forced block size ---
    logits_med = jax.random.normal(k2, (2, 4, 96, 96), dtype=jnp.float32) * 3.0
    out = jax.block_until_ready(
        _gan_loss_mean(logits_med, 1.0, "gan", min_pallas_elems=0))
    ok &= bool(jnp.allclose(out, _reference(logits_med, 1.0, "gan"), rtol=1e-5, atol=1e-5))
    out = jax.block_until_ready(
        _gan_loss_mean(logits_med, 0.0, "lsgan", min_pallas_elems=0,
                       block_bytes=64 * 1024))
    ok &= bool(jnp.allclose(out, _reference(logits_med, 0.0, "lsgan"), rtol=1e-5, atol=1e-5))

    assert ok
    print("KERNEL_OK")
</pallas_src>

<mosaic_0001>
module attributes {stable_mosaic.version = 11 : i64} {
  func.func @_gan_loss_sum_kernel(%arg0: i32, %arg1: memref<16x128xf32, #tpu.memory_space<vmem>>, %arg2: memref<1x1xf32, #tpu.memory_space<smem>>, %arg3: memref<8x128xf32, #tpu.memory_space<vmem>>) attributes {dimension_semantics = [#tpu.dimension_semantics<arbitrary>], iteration_bounds = array<i64: 1>, scalar_prefetch = 0 : i64, scratch_operands = 1 : i64, tpu.core_type = #tpu.core_type<tc>, window_params = [{transform_indices = @transform_0, window_bounds = array<i64: 16, 128>}, {transform_indices = @transform_1, window_bounds = array<i64: 1, 1>}]} {
    %c0_i32 = arith.constant 0 : i32
    %0 = arith.cmpi eq, %arg0, %c0_i32 : i32
    %1 = arith.extui %0 : i1 to i32
    %c0_i32_0 = arith.constant 0 : i32
    %2 = arith.cmpi ne, %1, %c0_i32_0 : i32
    scf.if %2 {
      %cst_13 = arith.constant 0.000000e+00 : f32
      %27 = vector.broadcast %cst_13 : f32 to vector<8x128xf32>
      %c0_14 = arith.constant 0 : index
      %c0_15 = arith.constant 0 : index
      %28 = vector.load %arg3[%c0_14, %c0_15] : memref<8x128xf32, #tpu.memory_space<vmem>>, vector<8x128xf32>
      tpu.vector_store %arg3[%c0_14, %c0_15], %27 {strides = array<i32>} : memref<8x128xf32, #tpu.memory_space<vmem>>, vector<8x128xf32>,
    } else {
    }
    %c0_i32_1 = arith.constant 0 : i32
    %c1_i32 = arith.constant 1 : i32
    %3 = arith.muli %c0_i32_1, %c1_i32 : i32
    %c0_i32_2 = arith.constant 0 : i32
    %4 = arith.addi %c0_i32_2, %3 : i32
    %c16_i32 = arith.constant 16 : i32
    %5 = arith.muli %4, %c16_i32 : i32
    %6 = tpu.assume_multiple %5, 16 : i32
    %7 = arith.index_cast %6 : i32 to index
    %c0 = arith.constant 0 : index
    %8 = vector.load %arg1[%7, %c0] : memref<16x128xf32, #tpu.memory_space<vmem>>, vector<16x128xf32>
    %9 = math.absf %8 : vector<16x128xf32>
    %cst = arith.constant 0.000000e+00 : f32
    %10 = vector.broadcast %cst : f32 to vector<16x128xf32>
    %11 = arith.subf %10, %9 : vector<16x128xf32>
    %12 = math.exp %11 : vector<16x128xf32>
    %13 = math.log1p %12 : vector<16x128xf32>
    %cst_3 = arith.constant 0.000000e+00 : f32
    %14 = vector.broadcast %cst_3 : f32 to vector<16x128xf32>
    %15 = arith.subf %14, %8 : vector<16x128xf32>
    %cst_4 = arith.constant 0.000000e+00 : f32
    %16 = vector.broadcast %cst_4 : f32 to vector<16x128xf32>
    %17 = arith.maximumf %15, %16 : vector<16x128xf32>
    %18 = arith.addf %17, %13 : vector<16x128xf32>
    %c0_5 = arith.constant 0 : index
    %c0_6 = arith.constant 0 : index
    %19 = vector.load %arg3[%c0_5, %c0_6] : memref<8x128xf32, #tpu.memory_space<vmem>>, vector<8x128xf32>
    %20 = vector.shape_cast %18 : vector<16x128xf32> to vector<2x8x128xf32>
    %cst_7 = arith.constant dense<0.000000e+00> : vector<8x128xf32>
    %21 = vector.multi_reduction <add>, %20, %cst_7 [0] : vector<2x8x128xf32> to vector<8x128xf32>
    %22 = arith.addf %19, %21 : vector<8x128xf32>
    %c0_8 = arith.constant 0 : index
    %c0_9 = arith.constant 0 : index
    %23 = vector.load %arg3[%c0_8, %c0_9] : memref<8x128xf32, #tpu.memory_space<vmem>>, vector<8x128xf32>
    tpu.vector_store %arg3[%c0_8, %c0_9], %22 {strides = array<i32>} : memref<8x128xf32, #tpu.memory_space<vmem>>, vector<8x128xf32>,
    %c1_i32_10 = arith.constant 1 : i32
    %c0_i32_11 = arith.constant 0 : i32
    %24 = arith.cmpi eq, %arg0, %c0_i32_11 : i32
    %25 = arith.extui %24 : i1 to i32
    %c0_i32_12 = arith.constant 0 : i32
    %26 = arith.cmpi ne, %25, %c0_i32_12 : i32
    scf.if %26 {
      %c0_13 = arith.constant 0 : index
      %c0_14 = arith.constant 0 : index
      %27 = vector.load %arg3[%c0_13, %c0_14] : memref<8x128xf32, #tpu.memory_space<vmem>>, vector<8x128xf32>
      %28 = vector.shape_cast %27 : vector<8x128xf32> to vector<1x8x128xf32>
      %cst_15 = arith.constant dense<0.000000e+00> : vector<1xf32>
      %29 = vector.multi_reduction <add>, %28, %cst_15 [1, 2] : vector<1x8x128xf32> to vector<1xf32>
      %30 = vector.shape_cast %29 : vector<1xf32> to vector<1x1x1xf32>
      %31 = vector.extract %30[0, 0, 0] : f32 from vector<1x1x1xf32>
      %c0_16 = arith.constant 0 : index
      %c0_17 = arith.constant 0 : index
      %32 = memref.load %arg2[%c0_16, %c0_17] : memref<1x1xf32, #tpu.memory_space<smem>>
      memref.store %31, %arg2[%c0_16, %c0_17] : memref<1x1xf32, #tpu.memory_space<smem>>
    } else {
    }
    return
  }
  func.func @transform_0(%arg0: i32) -> (i32, i32) {
    %c0_i32 = arith.constant 0 : i32
    %c0_i32_0 = arith.constant 0 : i32
    return %arg0, %c0_i32 : i32, i32
  }
  func.func @transform_1(%arg0: i32) -> (i32, i32) {
    %c0_i32 = arith.constant 0 : i32
    %c0_i32_0 = arith.constant 0 : i32
    %c0_i32_1 = arith.constant 0 : i32
    return %c0_i32, %c0_i32_0 : i32, i32
  }
}

</mosaic_0001>

<bundles_post_ra>
// kernel: tpu_custom_call.1
= control target key start
LH: loop header
LB: loop body
LE: loop exit
PB: predicated region body
PF: predicated region fallthrough
CT: control target
= control target key end

     0   :  { %6 = vsyncpa [#allocation4], 0  ;;  %s183_s0 = inlined_call_operand.hbm [shape: f32[16,128], index: 0, kind: input, shape index: {}]   ;;  %s184_s1 = inlined_call_operand.hbm [shape: f32[1,1], index: 1, kind: output, shape index: {}]  }
   0x1   :  { %7 = vsyncpa [#allocation5], 0  ;;  %s145_s6 = smov [#allocation3]   ;;  %s109_s10 = scalar_lea.hbm %s183_s0, 256 }
   0x2   :  { %s13_s7 = sshll.u32 %s145_s6, 4  ;;  %p110_p0 = scmp.ne.s32.totalorder %s183_s0, %s109_s10  ;;  %s14_s7 = int_to_ptr.vmem [resolvable:$true] %s13_s7 }
   0x3   :  { %p113_p1 = scmp.lt.u32.totalorder %s109_s10, %s183_s0 }
   0x5   :  { %p115_p2 = pnand %p113_p1, %p110_p0 }
   0x7   :  { %118 = shalt.err (!%p115_p2)
}
   0x8   :  { %s119_s15 = scalar_lea.vmem %s14_s7, 256  ;;  %p124_p4 = scmp.lt.s32.totalorder %s14_s7, %s14_s7 }
   0x9   :  { %p120_p3 = scmp.ne.s32.totalorder %s14_s7, %s119_s15  ;;  %p125_p5 = scmp.lt.s32.totalorder %s119_s15, %s119_s15 }
   0xb   :  { %p126_p6 = por %p125_p5, %p124_p4 }
   0xd   :  { %p127_p7 = pnand %p126_p6, %p120_p3 }
   0xf   :  { %130 = shalt.err (!%p127_p7)
}
  0x10   :  { %s146_s16 = smov 128   ;;  %s147_s17 = smov 8  }
  0x11   :  { %19 = dma.hbm_to_vmem [thread:$0]  %s183_s0, 256, %s14_s7, [#allocation4], %s146_s16, %s146_s16, %s147_s17  }
  0x12   :  { %141 = dma.done.wait [#allocation4], 256  }
  0x13   :  { %142 = vsyncadd [#allocation4], 4294967040  ;;  %v28_v0 = vld [vmem:[#allocation3] sm:$0xff]  ;;  %v29_v1 = vld [vmem:[#allocation3 + $0x8] sm:$0xff]  ;;  %s131_s22 = scalar_lea.hbm %s184_s1, 16 }
  0x14   :  { %v30_v2 = vand.u32 2147483647, %v28_v0  ;;  %v31_v3 = vand.u32 2147483647, %v29_v1  ;;  %v56_v17 = vsub.f32 0.0, %v28_v0  ;;  %v57_v19 = vsub.f32 0.0, %v29_v1  ;;  %p132_p8 = scmp.ne.s32.totalorder %s184_s1, %s131_s22  ;;  %p135_p9 = scmp.lt.u32.totalorder %s131_s22, %s184_s1 }
  0x16   :  { %v32_v4 = vsub.f32 0.0, %v30_v2  ;;  %v33_v5 = vsub.f32 0.0, %v31_v3  ;;  %v58_v23 = vmax.f32 %v56_v17, 0.0  ;;  %v59_v26 = vmax.f32 %v57_v19, 0.0  ;;  %p137_p10 = pnand %p135_p9, %p132_p8 }
  0x18   :  { %v34_v6 = vmul.f32 1.442695, %v32_v4  ;;  %v36_v7 = vmul.f32 1.442695, %v33_v5 }
  0x1a   :  { %101 = vpow2.f32 %v34_v6 }
  0x1b   :  { %103 = vpow2.f32 %v36_v7 }
  0x24   :  { %v102_v8 = vpop.eup %101 }
  0x25   :  { %v104_v9 = vpop.eup %103  ;;  %v38_v10 = vadd.f32 1.0, %v102_v8  ;;  %v41_v12 = vmul.f32 -0.5, %v102_v8  ;;  %v44_v15 = vand.u32 2147483647, %v102_v8 }
  0x26   :  { %v47_v11 = vadd.f32 1.0, %v104_v9  ;;  %v50_v13 = vmul.f32 -0.5, %v104_v9  ;;  %v53_v18 = vand.u32 2147483647, %v104_v9 }
  0x27   :  { %105 = vlog2.f32 %v38_v10  ;;  %v42_v14 = vadd.f32 1.0, %v41_v12  ;;  %vm45_vm0 = vcmp.lt.f32.partialorder %v44_v15, 0.0004427343 }
  0x28   :  { %107 = vlog2.f32 %v47_v11  ;;  %v51_v16 = vadd.f32 1.0, %v50_v13  ;;  %vm54_vm1 = vcmp.lt.f32.partialorder %v53_v18, 0.0004427343 }
  0x29   :  { %v43_v20 = vmul.f32 %v102_v8, %v42_v14 }
  0x2a   :  { %v52_v22 = vmul.f32 %v104_v9, %v51_v16 }
  0x31   :  { %v106_v21 = vpop.eup %105 }
  0x32   :  { %v108_v24 = vpop.eup %107  ;;  %v40_v25 = vmul.f32 0.6931472, %v106_v21 }
  0x33   :  { %v49_v27 = vmul.f32 0.6931472, %v108_v24 }
  0x34   :  { %v46_v28 = vsel %vm45_vm0, %v43_v20, %v40_v25 }
  0x35   :  { %v55_v29 = vsel %vm54_vm1, %v52_v22, %v49_v27  ;;  %v60_v30 = vadd.f32 %v58_v23, %v46_v28 }
  0x36   :  { %v61_v31 = vadd.f32 %v59_v26, %v55_v29 }
  0x38   :  { %v63_v32 = vadd.f32 %v61_v31, %v60_v30 }
  0x3a   :  { %70 = vadd.xlane.f32.xlu0 %v63_v32 }
  0xc7   :  { %v71_v33 = vpop.xlane.xlu0 %70 }
  0xc8   :  { %v72_v34 = vrot.slane %v71_v33, 4 }
  0xca   :  { %v73_v35 = vadd.f32 %v72_v34, %v71_v33 }
  0xcc   :  { %v74_v36 = vrot.slane %v73_v35, 2 }
  0xce   :  { %v75_v37 = vadd.f32 %v74_v36, %v73_v35 }
  0xd0   :  { %v76_v38 = vrot.slane %v75_v37, 1 }
  0xd2   :  { %v77_v39 = vadd.f32 %v76_v38, %v75_v37 }
  0xd4   :  { %95 = vpush %v77_v39 }
 0x105   :  { %s96_s0 = spop %95 }
 0x106   :  { %80 = sst [smem:[#allocation6]] %s96_s0 }
 0x107   :  { %140 = shalt.err (!%p137_p10)
}
 0x108   :  { %s148_s27 = smov [#allocation6]  }
 0x109   :  { %88 = dma.smem_to_hbm %s148_s27, 16, %s184_s1, [#allocation5]  }
 0x10a   :  { %143 = dma.done.wait [#allocation5], 16  }
 0x10b   :  { %144 = vsyncadd [#allocation5], 4294967280 }
 0x10c   :  { %92 = sfence }
 0x10d   :  { %93 = vsyncpa [#allocation4], 1 }
 0x10e   :  { %94 = vsyncpa [#allocation5], 1 }

</bundles_post_ra>
